<compile_context>
chip_gen: v5e
topology: v5e:2x2
jax: 0.10.0
libtpu: 0.0.40
codegen_flags: <defaults>
</compile_context>

<pallas_src>
import functools
import numpy as np

import jax
import jax.numpy as jnp
from jax.experimental import pallas as pl
from jax.experimental.pallas import tpu as pltpu


def _round_up(x, m):
    return ((x + m - 1) // m) * m


# ----------------------------------------------------------------------------
# Optional single-buffering of grid-invariant operands (probed once).
# ----------------------------------------------------------------------------
@functools.lru_cache(maxsize=None)
def _buffered1_supported():
    """Probe pipeline_mode=pl.Buffered(1); fall back to default double-buffer."""
    try:
        def _probe(x_ref, w_ref, o_ref):
            o_ref[...] = x_ref[...] + w_ref[...]

        x = jnp.arange(16 * 128, dtype=jnp.float32).reshape(16, 128)
        w = jnp.full((8, 128), 2.0, jnp.float32)
        out = pl.pallas_call(
            _probe,
            out_shape=jax.ShapeDtypeStruct((16, 128), jnp.float32),
            grid=(2,),
            in_specs=[
                pl.BlockSpec((8, 128), lambda i: (i, 0)),
                pl.BlockSpec((8, 128), lambda i: (0, 0),
                             pipeline_mode=pl.Buffered(1)),
            ],
            out_specs=pl.BlockSpec((8, 128), lambda i: (i, 0)),
        )(x, w)
        out = jax.block_until_ready(out)
        return bool(jnp.allclose(out, x + 2.0))
    except Exception:
        return False


def _inv_spec(shape, index_map):
    """BlockSpec for a grid-invariant operand; single-buffer it when supported."""
    if _buffered1_supported():
        return pl.BlockSpec(shape, index_map, pipeline_mode=pl.Buffered(1))
    return pl.BlockSpec(shape, index_map)


# ----------------------------------------------------------------------------
# STFT window / frequency construction (static, Python-side)
# ----------------------------------------------------------------------------
def _make_window(window_type, w):
    n = np.arange(w, dtype=np.float64)
    if w == 1:
        return np.ones(1, dtype=np.float64)
    if window_type == "hann":
        return 0.5 * (1.0 - np.cos(2.0 * np.pi * n / (w - 1)))
    if window_type == "hamming":
        return 0.54 - 0.46 * np.cos(2.0 * np.pi * n / (w - 1))
    return np.ones(w, dtype=np.float64)  # 'rect'


def _stft_freqs_wins(gridsize, window_size, stride, window_type):
    num_windows = max(1, (gridsize - window_size) // stride + 1)
    win = _make_window(window_type, window_size)
    freqs, wins = [], []
    for w in range(num_windows):
        for j in range(window_size):
            freqs.append(w * stride + j + 1)  # 1-based integer frequencies
            wins.append(float(win[j]))
    return np.asarray(freqs, np.int64), np.asarray(wins, np.float32)


# ----------------------------------------------------------------------------
# KAN layer parameter prep:
#   - per-(window,freq) cos/sin coefficients (same init as reference impl)
#   - window weights folded into coefficients over the integer frequency range
#     1..Fmax  (exactly the same forward, fewer transcendentals)
#   - T: (Din, F*Din) "repeat x and scale by integer frequency" matrix so that
#     kx = x @ T is the lane-dense packed phase block
#   - Wc / Ws: (F*Din, Dout[_pad]) bf16 coefficient stacks, bias f32
# ----------------------------------------------------------------------------
def _prep_kan_layer(key, din, dout, gridsize, window_size, stride, smooth,
                    window_type, pad_out=True):
    freqs_e, wins_e = _stft_freqs_wins(gridsize, window_size, stride, window_type)
    n_e = len(freqs_e)
    if smooth:
        norm = freqs_e.astype(np.float64) ** 2
    else:
        norm = np.full((n_e,), np.sqrt(float(n_e)), dtype=np.float64)
    scale = (1.0 / (np.sqrt(float(din)) * norm)).astype(np.float32)

    kc, ks = jax.random.split(key)
    ccos = jax.random.normal(kc, (n_e, din, dout), jnp.float32) * scale[:, None, None]
    csin = jax.random.normal(ks, (n_e, din, dout), jnp.float32) * scale[:, None, None]

    fmax = int(freqs_e.max())                       # dedup to integers 1..Fmax
    fold = np.zeros((fmax, n_e), np.float32)        # fold[f-1, e] = window weight
    for e in range(n_e):
        fold[int(freqs_e[e]) - 1, e] = wins_e[e]
    fold = jnp.asarray(fold)
    ccos_eff = jnp.einsum("fe,eio->fio", fold, ccos)          # (Fmax, din, dout)
    csin_eff = jnp.einsum("fe,eio->fio", fold, csin)

    # Phase-expansion matrix:  (x @ T)[:, f*din + d] = (f+1) * x[:, d]
    t = np.zeros((din, fmax * din), np.float32)
    for f in range(fmax):
        t[np.arange(din), f * din + np.arange(din)] = float(f + 1)

    dout_pad = _round_up(dout, 128) if pad_out else dout      # lane-dense output
    wc = ccos_eff.reshape(fmax * din, dout)
    ws = csin_eff.reshape(fmax * din, dout)
    if dout_pad != dout:
        wc = jnp.pad(wc, ((0, 0), (0, dout_pad - dout)))
        ws = jnp.pad(ws, ((0, 0), (0, dout_pad - dout)))
    return dict(
        t=jnp.asarray(t),
        wc=wc.astype(jnp.bfloat16),
        ws=ws.astype(jnp.bfloat16),
        bias=jnp.zeros((1, dout_pad), jnp.float32),   # addbias=True, zero init
        din=din, dout=dout, dout_pad=dout_pad, kc=fmax * din,
    )


# ----------------------------------------------------------------------------
# In-kernel STFT-Fourier-KAN layer helper (lane-dense phases, 2 packed EUP
# passes, bf16 MXU, bias epilogue).
# TODO(synk): exploit integer frequencies with the angle-addition recurrence
# (cos((k+1)x) from cos(kx), sin(kx)) to cut EUP work by another factor of F.
# ----------------------------------------------------------------------------
def _kan_apply(x, t_ref, wc_ref, ws_ref, b_ref):
    kx = jnp.dot(x, t_ref[...], preferred_element_type=jnp.float32)   # (rows, F*Din)
    y = jnp.dot(jnp.cos(kx).astype(jnp.bfloat16), wc_ref[...],
                preferred_element_type=jnp.float32)
    y = y + jnp.dot(jnp.sin(kx).astype(jnp.bfloat16), ws_ref[...],
                    preferred_element_type=jnp.float32)
    return y + b_ref[...]


# ----------------------------------------------------------------------------
# Standalone KAN layer kernel (linear1 / linear2)
# ----------------------------------------------------------------------------
def _kan_kernel(x_ref, t_ref, wc_ref, ws_ref, b_ref, o_ref):
    o_ref[...] = _kan_apply(x_ref[...].astype(jnp.float32),
                            t_ref, wc_ref, ws_ref, b_ref)


def kan_layer(x, layer, tile_n=256):
    t, wc, ws, b = layer["t"], layer["wc"], layer["ws"], layer["bias"]
    din, dout, dout_pad, kc = layer["din"], layer["dout"], layer["dout_pad"], layer["kc"]
    n = x.shape[0]
    x = x.astype(jnp.float32)

    n_pad8 = _round_up(max(n, 1), 8)
    tn = min(_round_up(tile_n, 8), n_pad8)
    n_pad = _round_up(n, tn)
    if n_pad != n:
        # TODO(synk): handle the ragged tail in-kernel (scalar-prefetch row count)
        # to avoid this wrapper-side pad copy.
        x = jnp.pad(x, ((0, n_pad - n), (0, 0)))

    out = pl.pallas_call(
        _kan_kernel,
        out_shape=jax.ShapeDtypeStruct((n_pad, dout_pad), jnp.float32),
        grid_spec=pltpu.PrefetchScalarGridSpec(
            num_scalar_prefetch=0,
            grid=(n_pad // tn,),
            in_specs=[
                pl.BlockSpec((tn, din), lambda i: (i, 0)),
                _inv_spec((din, kc), lambda i: (0, 0)),
                _inv_spec((kc, dout_pad), lambda i: (0, 0)),
                _inv_spec((kc, dout_pad), lambda i: (0, 0)),
                _inv_spec((1, dout_pad), lambda i: (0, 0)),
            ],
            out_specs=pl.BlockSpec((tn, dout_pad), lambda i: (i, 0)),
        ),
        compiler_params=pltpu.CompilerParams(dimension_semantics=("parallel",)),
    )(x, t, wc, ws, b)
    return out[:n, :dout]


# ----------------------------------------------------------------------------
# Fused DynamicEdgeConv MLP: conv1 -> conv2 -> k-neighbor max/mean, one kernel.
# Edge features arrive neighbor-major as (k, N, 6) so the k edges of each point
# tile sit in k contiguous, sublane-aligned row slabs inside the kernel.
# ----------------------------------------------------------------------------
def _edge_conv_kernel(e_ref, t1_ref, wc1_ref, ws1_ref, b1_ref,
                      t2_ref, wc2_ref, ws2_ref, b2_ref, o_ref, *, aggr):
    kk, tp, din = e_ref.shape
    x = e_ref[...].astype(jnp.float32).reshape(kk * tp, din)     # cheap: tp % 8 == 0

    h = _kan_apply(x, t1_ref, wc1_ref, ws1_ref, b1_ref)          # (k*tp, 64)  VMEM only
    h = _kan_apply(h, t2_ref, wc2_ref, ws2_ref, b2_ref)          # (k*tp, 128) VMEM only

    agg = h[0:tp, :]
    for j in range(1, kk):                                       # sublane-aligned slabs
        hj = h[j * tp:(j + 1) * tp, :]
        agg = jnp.maximum(agg, hj) if aggr == "max" else agg + hj
    if aggr != "max":
        agg = agg * (1.0 / kk)
    o_ref[...] = agg


def edge_conv_fused(edge_feat, layer1, layer2, aggr, edge_rows_per_tile=1024):
    k, n, din = edge_feat.shape
    dout = layer2["dout_pad"]                                    # 128, lane-dense

    tp = max(8, (edge_rows_per_tile // k) // 8 * 8)              # points per tile
    n_pad8 = _round_up(max(n, 1), 8)
    tp = min(tp, n_pad8)
    n_pad = _round_up(n, tp)
    if n_pad != n:
        edge_feat = jnp.pad(edge_feat, ((0, 0), (0, n_pad - n), (0, 0)))

    kernel = functools.partial(_edge_conv_kernel, aggr=aggr)
    out = pl.pallas_call(
        kernel,
        out_shape=jax.ShapeDtypeStruct((n_pad, dout), jnp.float32),
        grid_spec=pltpu.PrefetchScalarGridSpec(
            num_scalar_prefetch=0,
            grid=(n_pad // tp,),
            in_specs=[
                pl.BlockSpec((k, tp, din), lambda i: (0, i, 0)),
                _inv_spec((layer1["din"], layer1["kc"]), lambda i: (0, 0)),
                _inv_spec((layer1["kc"], layer1["dout_pad"]), lambda i: (0, 0)),
                _inv_spec((layer1["kc"], layer1["dout_pad"]), lambda i: (0, 0)),
                _inv_spec((1, layer1["dout_pad"]), lambda i: (0, 0)),
                _inv_spec((layer2["din"], layer2["kc"]), lambda i: (0, 0)),
                _inv_spec((layer2["kc"], layer2["dout_pad"]), lambda i: (0, 0)),
                _inv_spec((layer2["kc"], layer2["dout_pad"]), lambda i: (0, 0)),
                _inv_spec((1, layer2["dout_pad"]), lambda i: (0, 0)),
            ],
            out_specs=pl.BlockSpec((tp, dout), lambda i: (i, 0)),
        ),
        compiler_params=pltpu.CompilerParams(dimension_semantics=("parallel",)),
    )(edge_feat, layer1["t"], layer1["wc"], layer1["ws"], layer1["bias"],
      layer2["t"], layer2["wc"], layer2["ws"], layer2["bias"])
    return out[:n]


# ----------------------------------------------------------------------------
# Pallas kernel: masked pairwise squared distances for the kNN graph,
# tiled over rows AND columns, lane-dense (128-padded) column blocks.
# ----------------------------------------------------------------------------
def _knn_dist_kernel(pi_ref, bi_ref, pjt_ref, sqj_ref, bj_ref, d_ref):
    pi = pi_ref[...]                                             # (TR, 3)
    d = (jnp.sum(pi * pi, axis=-1, keepdims=True) + sqj_ref[...]
         - 2.0 * jnp.dot(pi, pjt_ref[...], preferred_element_type=jnp.float32))
    same = bi_ref[...] == bj_ref[...]                            # (TR, TC)
    d_ref[...] = jnp.where(same, d, jnp.float32(1e30))


def knn_indices(pos, batch, k, tile_rows=256, tile_cols=512):
    # TODO(synk): for very large N, keep a per-row running top-k in VMEM scratch
    # over the column tiles instead of materializing the dense distance matrix.
    n = pos.shape[0]
    pos = pos.astype(jnp.float32)
    batch = batch.astype(jnp.int32)

    tr = min(_round_up(tile_rows, 8), _round_up(n, 8))
    tc = min(_round_up(tile_cols, 128), _round_up(n, 128))
    n_rpad = _round_up(n, tr)
    n_cpad = _round_up(n, tc)

    pos_rows = jnp.pad(pos, ((0, n_rpad - n), (0, 0)))
    b_rows = jnp.pad(batch, (0, n_rpad - n), constant_values=-1).reshape(n_rpad, 1)

    pos_cols = jnp.pad(pos, ((0, n_cpad - n), (0, 0)))
    pos_cols_t = pos_cols.T                                      # (3, Ncpad)
    sq_cols = jnp.sum(pos_cols * pos_cols, axis=-1).reshape(1, n_cpad)
    b_cols = jnp.pad(batch, (0, n_cpad - n), constant_values=-1).reshape(1, n_cpad)

    d = pl.pallas_call(
        _knn_dist_kernel,
        out_shape=jax.ShapeDtypeStruct((n_rpad, n_cpad), jnp.float32),
        grid_spec=pltpu.PrefetchScalarGridSpec(
            num_scalar_prefetch=0,
            grid=(n_rpad // tr, n_cpad // tc),
            in_specs=[
                pl.BlockSpec((tr, 3), lambda i, j: (i, 0)),
                pl.BlockSpec((tr, 1), lambda i, j: (i, 0)),
                pl.BlockSpec((3, tc), lambda i, j: (0, j)),
                pl.BlockSpec((1, tc), lambda i, j: (0, j)),
                pl.BlockSpec((1, tc), lambda i, j: (0, j)),
            ],
            out_specs=pl.BlockSpec((tr, tc), lambda i, j: (i, j)),
        ),
        compiler_params=pltpu.CompilerParams(
            dimension_semantics=("parallel", "parallel")),
    )(pos_rows, b_rows, pos_cols_t, sq_cols, b_cols)

    d = d[:n]                                                    # padded cols hold 1e30
    # Self is included (distance 0), matching torch_cluster.knn on identical
    # query/source sets as used by PyG's DynamicEdgeConv.
    _, idx = jax.lax.top_k(-d, k)                                # (N, k)
    return idx


# ----------------------------------------------------------------------------
# Full model
# ----------------------------------------------------------------------------
class STFTfourierKanDGCNNPallas:
    def __init__(self, out_channels, k, aggr, emb_dims,
                 g2, w2, s2, g3, w3, s3, sm2, sm3, wtp2, wtp3,
                 g4, w4, s4, g5, w5, s5, sm4, sm5, wtp4, wtp5, key):
        self.k = k
        self.aggr = aggr
        self.emb_dims = emb_dims

        k1, k2, k3, k4 = jax.random.split(key, 4)
        # conv layers stay unpadded (64 / 128 cols): intermediates live in VMEM only.
        self.l_conv1 = _prep_kan_layer(k1, 6, 64, g2, w2, s2, sm2, wtp2, pad_out=False)
        self.l_conv2 = _prep_kan_layer(k2, 64, 128, g3, w3, s3, sm3, wtp3, pad_out=False)
        self.l_lin1 = _prep_kan_layer(k3, 128, emb_dims, g4, w4, s4, sm4, wtp4)
        self.l_lin2 = _prep_kan_layer(k4, emb_dims * 2, out_channels, g5, w5, s5,
                                      sm5, wtp5)

    def __call__(self, pos, batch, num_graphs):
        n = pos.shape[0]
        pos = pos.astype(jnp.float32)

        # ----- DynamicEdgeConv(stft_layers, k, aggr) -----
        idx = knn_indices(pos, batch, self.k)                    # (N, k)
        pos_j = pos[idx.T]                                       # (k, N, 3) neighbor-major
        pos_i = jnp.broadcast_to(pos[None, :, :], pos_j.shape)
        edge_feat = jnp.concatenate([pos_i, pos_j - pos_i], axis=-1)   # (k, N, 6)

        x1 = edge_conv_fused(edge_feat, self.l_conv1, self.l_conv2, self.aggr)  # (N,128)

        # ----- linear1 -----
        x = kan_layer(x1, self.l_lin1, tile_n=256)               # (N, emb_dims)

        # ----- global max / mean pool over graphs (batch sorted, as in PyG) -----
        seg = batch.astype(jnp.int32)
        gmax = jax.ops.segment_max(x, seg, num_segments=num_graphs,
                                   indices_are_sorted=True)
        gsum = jax.ops.segment_sum(x, seg, num_segments=num_graphs,
                                   indices_are_sorted=True)
        counts = jax.ops.segment_sum(jnp.ones((n, 1), jnp.float32), seg,
                                     num_segments=num_graphs,
                                     indices_are_sorted=True)
        xg = jnp.concatenate([gmax, gsum / counts], axis=1)      # (B, 2*emb_dims)

        # ----- linear2 -----
        return kan_layer(xg, self.l_lin2)                        # (B, out_channels)


# ----------------------------------------------------------------------------
# Example run
# ----------------------------------------------------------------------------
if __name__ == "__main__":
    key = jax.random.PRNGKey(0)
    k_pos, k_params = jax.random.split(key)

    num_graphs = 2
    points_per_graph = 16
    n = num_graphs * points_per_graph

    pos = jax.random.normal(k_pos, (n, 3), jnp.float32)
    batch = jnp.repeat(jnp.arange(num_graphs, dtype=jnp.int32), points_per_graph)

    model = STFTfourierKanDGCNNPallas(
        out_channels=10, k=4, aggr="max", emb_dims=64,
        g2=8, w2=4, s2=2, g3=6, w3=3, s3=1,
        sm2=True, sm3=False, wtp2="hann", wtp3="hamming",
        g4=8, w4=4, s4=2, g5=6, w5=3, s5=1,
        sm4=True, sm5=False, wtp4="hamming", wtp5="rect",
        key=k_params,
    )

    out = model(pos, batch, num_graphs)
    out = jax.block_until_ready(out)

    assert out.shape == (num_graphs, 10), out.shape
    assert bool(jnp.all(jnp.isfinite(out)))
    print("KERNEL_OK")
</pallas_src>

<mosaic_0001>
module attributes {stable_mosaic.version = 11 : i64} {
  func.func @_knn_dist_kernel(%arg0: i32, %arg1: i32, %arg2: memref<32x3xf32, #tpu.memory_space<vmem>>, %arg3: memref<32x1xi32, #tpu.memory_space<vmem>>, %arg4: memref<3x128xf32, #tpu.memory_space<vmem>>, %arg5: memref<1x128xf32, #tpu.memory_space<vmem>>, %arg6: memref<1x128xi32, #tpu.memory_space<vmem>>, %arg7: memref<32x128xf32, #tpu.memory_space<vmem>>) attributes {dimension_semantics = [#tpu.dimension_semantics<parallel>, #tpu.dimension_semantics<parallel>], iteration_bounds = array<i64: 1, 1>, scalar_prefetch = 0 : i64, scratch_operands = 0 : i64, tpu.core_type = #tpu.core_type<tc>, window_params = [{transform_indices = @transform_0, window_bounds = array<i64: 32, 3>}, {transform_indices = @transform_1, window_bounds = array<i64: 32, 1>}, {transform_indices = @transform_2, window_bounds = array<i64: 3, 128>}, {transform_indices = @transform_3, window_bounds = array<i64: 1, 128>}, {transform_indices = @transform_4, window_bounds = array<i64: 1, 128>}, {transform_indices = @transform_5, window_bounds = array<i64: 32, 128>}]} {
    %c0 = arith.constant 0 : index
    %c0_0 = arith.constant 0 : index
    %0 = vector.load %arg2[%c0, %c0_0] : memref<32x3xf32, #tpu.memory_space<vmem>>, vector<32x3xf32>
    %1 = arith.mulf %0, %0 : vector<32x3xf32>
    %cst = arith.constant dense<0.000000e+00> : vector<32xf32>
    %2 = vector.multi_reduction <add>, %1, %cst [1] : vector<32x3xf32> to vector<32xf32>
    %3 = vector.shape_cast %2 : vector<32xf32> to vector<32x1xf32>
    %c0_1 = arith.constant 0 : index
    %c0_2 = arith.constant 0 : index
    %4 = vector.load %arg5[%c0_1, %c0_2] : memref<1x128xf32, #tpu.memory_space<vmem>>, vector<1x128xf32>
    %5 = vector.broadcast %3 : vector<32x1xf32> to vector<32x128xf32>
    %6 = vector.broadcast %4 : vector<1x128xf32> to vector<32x128xf32>
    %7 = arith.addf %5, %6 : vector<32x128xf32>
    %c0_3 = arith.constant 0 : index
    %c0_4 = arith.constant 0 : index
    %8 = vector.load %arg4[%c0_3, %c0_4] : memref<3x128xf32, #tpu.memory_space<vmem>>, vector<3x128xf32>
    %cst_5 = arith.constant dense<0.000000e+00> : vector<32x128xf32>
    %9 = tpu.matmul %0, %8, %cst_5 {dimension_numbers = #tpu.dot_dimension_numbers<[1], [0], [0], [1], [0, 0, 1, 1], [], []>} : vector<32x3xf32>, vector<3x128xf32>, vector<32x128xf32> -> vector<32x128xf32>
    %cst_6 = arith.constant 2.000000e+00 : f32
    %10 = vector.broadcast %cst_6 : f32 to vector<32x128xf32>
    %11 = arith.mulf %10, %9 : vector<32x128xf32>
    %12 = arith.subf %7, %11 : vector<32x128xf32>
    %c0_7 = arith.constant 0 : index
    %c0_8 = arith.constant 0 : index
    %13 = vector.load %arg3[%c0_7, %c0_8] : memref<32x1xi32, #tpu.memory_space<vmem>>, vector<32x1xi32>
    %c0_9 = arith.constant 0 : index
    %c0_10 = arith.constant 0 : index
    %14 = vector.load %arg6[%c0_9, %c0_10] : memref<1x128xi32, #tpu.memory_space<vmem>>, vector<1x128xi32>
    %15 = vector.broadcast %13 : vector<32x1xi32> to vector<32x128xi32>
    %16 = vector.broadcast %14 : vector<1x128xi32> to vector<32x128xi32>
    %17 = arith.cmpi eq, %15, %16 : vector<32x128xi32>
    %cst_11 = arith.constant 1.000000e+30 : f32
    %18 = vector.broadcast %cst_11 : f32 to vector<32x128xf32>
    %19 = arith.select %17, %12, %18 : vector<32x128xi1>, vector<32x128xf32>
    %c0_12 = arith.constant 0 : index
    %c0_13 = arith.constant 0 : index
    %20 = vector.load %arg7[%c0_12, %c0_13] : memref<32x128xf32, #tpu.memory_space<vmem>>, vector<32x128xf32>
    tpu.vector_store %arg7[%c0_12, %c0_13], %19 {strides = array<i32>} : memref<32x128xf32, #tpu.memory_space<vmem>>, vector<32x128xf32>,
    return
  }
  func.func @transform_0(%arg0: i32, %arg1: i32) -> (i32, i32) {
    %c0_i32 = arith.constant 0 : i32
    %c0_i32_0 = arith.constant 0 : i32
    return %arg0, %c0_i32 : i32, i32
  }
  func.func @transform_1(%arg0: i32, %arg1: i32) -> (i32, i32) {
    %c0_i32 = arith.constant 0 : i32
    %c0_i32_0 = arith.constant 0 : i32
    return %arg0, %c0_i32 : i32, i32
  }
  func.func @transform_2(%arg0: i32, %arg1: i32) -> (i32, i32) {
    %c0_i32 = arith.constant 0 : i32
    %c0_i32_0 = arith.constant 0 : i32
    return %c0_i32, %arg1 : i32, i32
  }
  func.func @transform_3(%arg0: i32, %arg1: i32) -> (i32, i32) {
    %c0_i32 = arith.constant 0 : i32
    %c0_i32_0 = arith.constant 0 : i32
    return %c0_i32, %arg1 : i32, i32
  }
  func.func @transform_4(%arg0: i32, %arg1: i32) -> (i32, i32) {
    %c0_i32 = arith.constant 0 : i32
    %c0_i32_0 = arith.constant 0 : i32
    return %c0_i32, %arg1 : i32, i32
  }
  func.func @transform_5(%arg0: i32, %arg1: i32) -> (i32, i32) {
    %c0_i32 = arith.constant 0 : i32
    return %arg0, %arg1 : i32, i32
  }
}

</mosaic_0001>

<bundles_post_ra>
// kernel: tpu_custom_call.1
= control target key start
LH: loop header
LB: loop body
LE: loop exit
PB: predicated region body
PF: predicated region fallthrough
CT: control target
= control target key end

     0   :  { %vm63_vm0 = vcmask 1042432   ;;  %vm29_vm1 = vcmask 23552   ;;  %s277_s0 = inlined_call_operand.vmem [shape: f32[32,3], index: 0, kind: input, shape index: {}]   ;;  %s278_s1 = inlined_call_operand.vmem [shape: s32[32,1], index: 1, kind: input, shape index: {}]   ;;  %s279_s2 = inlined_call_operand.vmem [shape: f32[3,128], index: 2, kind: input, shape index: {}]   ;;  %s280_s3 = inlined_call_operand.vmem [shape: f32[1,128], index: 3, kind: input, shape index: {}]   ;;  %s281_s4 = inlined_call_operand.vmem [shape: s32[1,128], index: 4, kind: input, shape index: {}]   ;;  %s282_s5 = inlined_call_operand.hbm [shape: f32[32,128], index: 5, kind: output, shape index: {}]  }
   0x1   :  { %v50_v0 = vld [vmem:[%s279_s2] sm:$0x7]  ;;  %v23_v2 = vld [vmem:[%s277_s0 + $0x10] sm:$0xff]  ;;  %v24_v3 = vld [vmem:[%s277_s0 + $0x18] sm:$0xff] }
   0x2   :  { %v21_v1 = vld [vmem:[%s277_s0] sm:$0xff]  ;;  %152 = vmatpush.msk.msra.mxu0 %vm63_vm0, %v50_v0  ;;  %158 = vmatpush.msk.msra.mxu2 %vm63_vm0, %v50_v0  ;;  %v27_v4 = vmul.f32 %v23_v2, %v23_v2  ;;  %v22_v6 = vld [vmem:[%s277_s0 + $0x8] sm:$0xff] }
   0x3   :  { %v25_v5 = vmul.f32 %v21_v1, %v21_v1  ;;  %159 = vmatpush.msk.msra.mxu3 %vm63_vm0, %v50_v0  ;;  %153 = vmatmul.msk.f32.vlgmr.msra.gmra.mxu0 %vm29_vm1, %v21_v1 }
   0x4   :  { %155 = vmatmul.msk.f32.vlgmr.msra.gmra.mxu2 %vm29_vm1, %v23_v2  ;;  %156 = vmatmul.msk.f32.vlgmr.msra.gmra.mxu3 %vm29_vm1, %v24_v3  ;;  %v36_v7 = vsel %vm29_vm1, %v27_v4, 0.0 }
   0x5   :  { %v30_v8 = vsel %vm29_vm1, %v25_v5, 0.0 }
   0x6   :  { %10 = vsyncpa [#allocation3], 0  ;;  %37 = vadd.xlane.f32.xlu1 %v36_v7  ;;  %31 = vadd.xlane.f32.xlu0 %v30_v8  ;;  %v28_v9 = vmul.f32 %v24_v3, %v24_v3  ;;  %v26_v10 = vmul.f32 %v22_v6, %v22_v6  ;;  %v195_v11 = vmov 0   ;;  %v104_v12 = vld [vmem:[%s278_s1] sm:$0xff]  ;;  %v105_v15 = vld [vmem:[%s278_s1 + $0x8] sm:$0xff]  ;;  %s140_s14 = sshll.u32 %s282_s5, 4  ;;  %s141_s14 = int_to_ptr.hbm [resolvable:$true] %s140_s14 }
   0x7   :  { %157 = vmatpush.msk.msra.mxu1 %vm63_vm0, %v50_v0  ;;  %165 = vset.pattern.permute.xlu0 %v195_v11  ;;  %v106_v16 = vld [vmem:[%s278_s1 + $0x10] sm:$0xff]  ;;  %v107_v17 = vld [vmem:[%s278_s1 + $0x18] sm:$0xff]  ;;  %v168_v20 = vld [vmem:[%s281_s4] ss:$0 sm:$0xff]  ;;  %s196_s1 = smov [#allocation2]   ;;  %s197_s15 = smov 128  }
   0x8   :  { %154 = vmatmul.msk.f32.vlgmr.msra.gmra.mxu1 %vm29_vm1, %v22_v6  ;;  %166 = vset.pattern.permute.xlu1 %v195_v11  ;;  %v39_v13 = vsel %vm29_vm1, %v28_v9, 0.0  ;;  %v33_v14 = vsel %vm29_vm1, %v26_v10, 0.0  ;;  %v167_v21 = vld [vmem:[%s280_s3] ss:$0 sm:$0xff]  ;;  %s138_s3 = sshll.u32 %s196_s1, 4  ;;  %s198_s16 = smov 8   ;;  %s139_s3 = int_to_ptr.vmem [resolvable:$true] %s138_s3 }
   0x9   :  { %164 = vset.pattern.permute.xlu2 %v195_v11 }
   0xa   :  { %110 = vperm.xlu2 %164, %v104_v12  }
   0xe   :  { %40 = vadd.xlane.f32.xlu1 %v39_v13  ;;  %34 = vadd.xlane.f32.xlu0 %v33_v14 }
  0x12   :  { %113 = vperm.xlu2 %164, %v105_v15  }
  0x22   :  { %116 = vperm.xlu0 %165, %v106_v16  }
  0x27   :  { %119 = vperm.xlu1 %166, %v107_v17  }
  0x64   :  { %v111_v19 = vpop.permute.xlu2 %110 }
  0x65   :  { %vm122_vm2 = vcmp.eq.s32.totalorder %v111_v19, %v168_v20 }
  0x6c   :  { %v114_v28 = vpop.permute.xlu2 %113 }
  0x6d   :  { %vm123_vm3 = vcmp.eq.s32.totalorder %v114_v28, %v168_v20 }
  0x79   :  { %v32_v18 = vpop.xlane.xlu0 %31  ;;  %v38_v32 = vpop.xlane.xlu1 %37 }
  0x7a   :  { %v46_v23 = vadd.f32 %v167_v21, %v32_v18  ;;  %v48_v38 = vadd.f32 %v167_v21, %v38_v32 }
  0x80   :  { %v84_v22 = vpop.f32.mrf.mxu0 }
  0x81   :  { %v96_v24 = vmul.f32 2.0, %v84_v22  ;;  %v35_v25 = vpop.xlane.xlu0 %34  ;;  %v41_v37 = vpop.xlane.xlu1 %40 }
  0x82   :  { %v47_v27 = vadd.f32 %v167_v21, %v35_v25  ;;  %v49_v44 = vadd.f32 %v167_v21, %v41_v37 }
  0x83   :  { %v100_v26 = vsub.f32 %v46_v23, %v96_v24 }
  0x85   :  { %v87_v29 = vpop.f32.mrf.mxu1  ;;  %v126_v30 = vsel %vm122_vm2, %v100_v26, 1e+30 }
  0x86   :  { %v97_v31 = vmul.f32 2.0, %v87_v29  ;;  %130 = vst [vmem:[#allocation2] sm:$0xff] %v126_v30 }
  0x87   :  { %v90_v35 = vpop.f32.mrf.mxu2  ;;  %v93_v39 = vpop.f32.mrf.mxu3 }
  0x88   :  { %v101_v33 = vsub.f32 %v47_v27, %v97_v31  ;;  %v98_v36 = vmul.f32 2.0, %v90_v35  ;;  %v99_v42 = vmul.f32 2.0, %v93_v39 }
  0x8a   :  { %v127_v34 = vsel %vm123_vm3, %v101_v33, 1e+30  ;;  %v102_v40 = vsub.f32 %v48_v38, %v98_v36  ;;  %v103_v45 = vsub.f32 %v49_v44, %v99_v42 }
  0x8b   :  { %131 = vst [vmem:[#allocation2 + $0x8] sm:$0xff] %v127_v34 }
  0x94   :  { %v117_v41 = vpop.permute.xlu0 %116 }
  0x95   :  { %vm124_vm4 = vcmp.eq.s32.totalorder %v117_v41, %v168_v20 }
  0x96   :  { %v128_v43 = vsel %vm124_vm4, %v102_v40, 1e+30 }
  0x97   :  { %132 = vst [vmem:[#allocation2 + $0x10] sm:$0xff] %v128_v43 }
  0x99   :  { %v120_v46 = vpop.permute.xlu1 %119 }
  0x9a   :  { %vm125_vm5 = vcmp.eq.s32.totalorder %v120_v46, %v168_v20 }
  0x9b   :  { %v129_v47 = vsel %vm125_vm5, %v103_v45, 1e+30 }
  0x9c   :  { %133 = vst [vmem:[#allocation2 + $0x18] sm:$0xff] %v129_v47 }
  0x9d   :  { %146 = dma.vmem_to_hbm [thread:$0]  %s139_s3, 512, %s141_s14, [#allocation3], %s197_s15, %s197_s15, %s198_s16  }
  0x9e   :  { %193 = dma.done.wait [#allocation3], 512  }
  0x9f   :  { %194 = vsyncadd [#allocation3], 4294966784 }
  0xa0   :  { %151 = vsyncpa [#allocation3], 1 }

</bundles_post_ra>
